<compile_context>
chip_gen: v5e
topology: v5e:2x2
jax: 0.10.0
libtpu: 0.0.40
codegen_flags: <defaults>
</compile_context>

<pallas_src>
import functools

import jax
import jax.numpy as jnp
from jax import lax
from jax.experimental import pallas as pl
from jax.experimental.pallas import tpu as pltpu


def _round_up(x, m):
    return (x + m - 1) // m * m


def _cdiv(a, b):
    return (a + b - 1) // b


def policy_act_kernel(obs_ref, w1_ref, b1_ref, wh_ref, bh_ref,
                      value_ref, action_ref, logp_ref, *, num_actions):
    # ---- net: simple MLP feature extractor ----
    feats = jnp.tanh(
        jnp.dot(obs_ref[...], w1_ref[...], preferred_element_type=jnp.float32)
        + b1_ref[...])                                        # [TB, H] f32

    # ---- fused heads: [logits | value] = feats @ [Wa | Wc^T] + [ba | bc] ----
    heads = (jnp.dot(feats.astype(wh_ref.dtype), wh_ref[...],
                     preferred_element_type=jnp.float32)
             + bh_ref[...])                                   # [TB, A+1] f32

    value = heads[:, num_actions:num_actions + 1]             # critic column

    # Mask the value column (and any padding) with -inf so max / argmax /
    # log-sum-exp only see real logits.
    col = lax.broadcasted_iota(jnp.int32, heads.shape, 1)
    logits = jnp.where(col < num_actions, heads, -jnp.inf)

    # ---- distribution.mode(): argmax, first-index tie-break (== torch) ----
    mx = jnp.max(logits, axis=-1, keepdims=True)
    big = jnp.iinfo(jnp.int32).max
    action = jnp.min(jnp.where(logits == mx, col, big), axis=-1, keepdims=True)

    # ---- distribution.log_probs(mode): selected logit IS the max ----
    lse = mx + jnp.log(jnp.sum(jnp.exp(logits - mx), axis=-1, keepdims=True))
    logp = mx - lse

    # Narrow per-row outputs (12 B/row total writeback).
    value_ref[...] = value
    action_ref[...] = action.astype(jnp.int32)
    logp_ref[...] = logp


def prepare_policy_params(params, *, use_bf16_inputs=False):
    """Once-per-parameter-update prep (hoisted out of the act() hot path)."""
    w_heads = jnp.concatenate([params["wa"], params["wc"].T], axis=1)  # [H, A+1]
    b_heads = jnp.concatenate([params["ba"], params["bc"]], axis=1)    # [1, A+1]
    w1, b1 = params["w1"], params["b1"]
    if use_bf16_inputs:
        # bf16 MXU inputs are safe on v5e/v6e/v7x; elementwise math stays f32
        # via preferred_element_type.  obs should be stored bf16 at the
        # producer for the HBM saving to be real.
        w1 = w1.astype(jnp.bfloat16)
        w_heads = w_heads.astype(jnp.bfloat16)
    return dict(w1=w1, b1=b1, w_heads=w_heads, b_heads=b_heads,
                num_actions=params["wa"].shape[1])


def net_policy_act(obs, prep, *, tile_b=2048):
    """Runs NetPolicy.act(deterministic=True) in one Pallas kernel."""
    B, D = obs.shape
    H = prep["w1"].shape[1]
    A = prep["num_actions"]

    # Fallback cast only if the caller did not provide obs in the matmul dtype
    # (ideally the rollout buffer already stores obs in that dtype).
    if obs.dtype != prep["w1"].dtype:
        obs = obs.astype(prep["w1"].dtype)

    # Batch tile: multiple of 8 sublanes; guarantee >=2 grid steps when B > 8
    # so both v7x TensorCores get work.  No wrapper-side pad: the last block is
    # ragged (undefined input rows, masked output writeback).
    TB = max(8, min(tile_b, _round_up(_cdiv(B, 2), 8)))
    grid = (_cdiv(B, TB),)

    kernel = functools.partial(policy_act_kernel, num_actions=A)
    value, action, logp = pl.pallas_call(
        kernel,
        out_shape=(
            jax.ShapeDtypeStruct((B, 1), jnp.float32),   # value
            jax.ShapeDtypeStruct((B, 1), jnp.int32),     # action (mode)
            jax.ShapeDtypeStruct((B, 1), jnp.float32),   # action_log_probs
        ),
        grid_spec=pltpu.PrefetchScalarGridSpec(
            num_scalar_prefetch=0,
            grid=grid,
            in_specs=[
                pl.BlockSpec((TB, D), lambda i: (i, 0)),      # obs tiled on batch
                pl.BlockSpec((D, H), lambda i: (0, 0)),       # weights resident
                pl.BlockSpec((1, H), lambda i: (0, 0)),
                pl.BlockSpec((H, A + 1), lambda i: (0, 0)),
                pl.BlockSpec((1, A + 1), lambda i: (0, 0)),
            ],
            out_specs=(
                pl.BlockSpec((TB, 1), lambda i: (i, 0)),
                pl.BlockSpec((TB, 1), lambda i: (i, 0)),
                pl.BlockSpec((TB, 1), lambda i: (i, 0)),
            ),
        ),
        compiler_params=pltpu.CompilerParams(
            dimension_semantics=("parallel",)),  # shard batch across TCs
    )(obs, prep["w1"], prep["b1"], prep["w_heads"], prep["b_heads"])
    return value, action, logp


def init_params(key, obs_dim, hidden, num_actions):
    """Deterministic synthetic parameter init (matches module shapes)."""
    k1, k2, k3 = jax.random.split(key, 3)
    # net: Linear(obs_dim -> hidden)
    w1 = jax.random.normal(k1, (obs_dim, hidden), jnp.float32) * 0.1
    b1 = jnp.zeros((1, hidden), jnp.float32)
    # CategoricalNet: Linear(hidden -> num_actions), gain 0.01
    wa = jax.random.normal(k2, (hidden, num_actions), jnp.float32) * 0.01
    ba = jnp.zeros((1, num_actions), jnp.float32)
    # CriticHead: Linear(hidden -> 1); stored transposed as [1, hidden]
    wc = jax.random.normal(k3, (1, hidden), jnp.float32) * 0.1
    bc = jnp.zeros((1, 1), jnp.float32)
    return dict(w1=w1, b1=b1, wa=wa, ba=ba, wc=wc, bc=bc)


def reference_act(obs, p):
    feats = jnp.tanh(obs @ p["w1"] + p["b1"])
    logits = feats @ p["wa"] + p["ba"]
    value = jnp.sum(feats * p["wc"], axis=-1, keepdims=True) + p["bc"]
    action = jnp.argmax(logits, axis=-1, keepdims=True)
    logp_all = jax.nn.log_softmax(logits, axis=-1)
    logp = jnp.take_along_axis(logp_all, action, axis=-1)
    return value, action.astype(jnp.int32), logp


if __name__ == "__main__":
    B, OBS_DIM, HIDDEN, NUM_ACTIONS = 8, 32, 32, 6  # Discrete(6) action space

    key = jax.random.PRNGKey(0)
    k_obs, k_par, k_obs2 = jax.random.split(key, 3)
    obs = jax.random.normal(k_obs, (B, OBS_DIM), jnp.float32)
    params = init_params(k_par, OBS_DIM, HIDDEN, NUM_ACTIONS)

    prep = prepare_policy_params(params)          # once per parameter update

    value, action, logp = net_policy_act(obs, prep)
    jax.block_until_ready((value, action, logp))

    v_ref, a_ref, lp_ref = reference_act(obs, params)
    assert value.shape == (B, 1) and action.shape == (B, 1) and logp.shape == (B, 1)
    assert value.dtype == jnp.float32 and action.dtype == jnp.int32
    assert jnp.allclose(value, v_ref, atol=1e-4)
    assert jnp.array_equal(action, a_ref)
    assert jnp.allclose(logp, lp_ref, atol=1e-4)

    # Exercise the multi-step grid with a ragged (non-multiple) last block.
    B2 = 1000
    obs2 = jax.random.normal(k_obs2, (B2, OBS_DIM), jnp.float32)
    v2, a2, lp2 = net_policy_act(obs2, prep)
    jax.block_until_ready((v2, a2, lp2))
    v2r, a2r, lp2r = reference_act(obs2, params)
    assert jnp.allclose(v2, v2r, atol=1e-4)
    assert jnp.array_equal(a2, a2r)
    assert jnp.allclose(lp2, lp2r, atol=1e-4)

    # bf16 matmul-input path (v5e/v6e/v7x): obs pre-cast as if stored bf16 by
    # the rollout producer.  Looser numerics, so only sanity-check here.
    prep_bf16 = prepare_policy_params(params, use_bf16_inputs=True)
    obs2_bf16 = obs2.astype(jnp.bfloat16)
    v3, a3, lp3 = net_policy_act(obs2_bf16, prep_bf16)
    jax.block_until_ready((v3, a3, lp3))
    assert v3.shape == (B2, 1) and a3.shape == (B2, 1) and lp3.shape == (B2, 1)
    assert bool(jnp.all(jnp.isfinite(v3))) and bool(jnp.all(jnp.isfinite(lp3)))

    # TODO(synk): stochastic sampling (deterministic=False), the Gaussian
    # action-distribution branch, and the abstract recurrent `net` are not
    # implemented; the feature extractor is instantiated as a 1-layer tanh MLP.
    print("KERNEL_OK")
</pallas_src>

<mosaic_0001>
module attributes {stable_mosaic.version = 11 : i64} {
  func.func @policy_act_kernel(%arg0: i32, %arg1: memref<8x32xf32, #tpu.memory_space<vmem>>, %arg2: memref<32x32xf32, #tpu.memory_space<vmem>>, %arg3: memref<1x32xf32, #tpu.memory_space<vmem>>, %arg4: memref<32x7xf32, #tpu.memory_space<vmem>>, %arg5: memref<1x7xf32, #tpu.memory_space<vmem>>, %arg6: memref<8x1xf32, #tpu.memory_space<vmem>>, %arg7: memref<8x1xi32, #tpu.memory_space<vmem>>, %arg8: memref<8x1xf32, #tpu.memory_space<vmem>>) attributes {dimension_semantics = [#tpu.dimension_semantics<parallel>], iteration_bounds = array<i64: 1>, scalar_prefetch = 0 : i64, scratch_operands = 0 : i64, tpu.core_type = #tpu.core_type<tc>, window_params = [{transform_indices = @transform_0, window_bounds = array<i64: 8, 32>}, {pipeline_mode = #tpu.pipeline_mode<synchronous>, transform_indices = @transform_1, window_bounds = array<i64: 32, 32>}, {pipeline_mode = #tpu.pipeline_mode<synchronous>, transform_indices = @transform_2, window_bounds = array<i64: 1, 32>}, {pipeline_mode = #tpu.pipeline_mode<synchronous>, transform_indices = @transform_3, window_bounds = array<i64: 32, 7>}, {pipeline_mode = #tpu.pipeline_mode<synchronous>, transform_indices = @transform_4, window_bounds = array<i64: 1, 7>}, {transform_indices = @transform_5, window_bounds = array<i64: 8, 1>}, {transform_indices = @transform_6, window_bounds = array<i64: 8, 1>}, {transform_indices = @transform_7, window_bounds = array<i64: 8, 1>}]} {
    %c0 = arith.constant 0 : index
    %c0_0 = arith.constant 0 : index
    %0 = vector.load %arg1[%c0, %c0_0] : memref<8x32xf32, #tpu.memory_space<vmem>>, vector<8x32xf32>
    %c0_1 = arith.constant 0 : index
    %c0_2 = arith.constant 0 : index
    %1 = vector.load %arg2[%c0_1, %c0_2] : memref<32x32xf32, #tpu.memory_space<vmem>>, vector<32x32xf32>
    %cst = arith.constant dense<0.000000e+00> : vector<8x32xf32>
    %2 = tpu.matmul %0, %1, %cst {dimension_numbers = #tpu.dot_dimension_numbers<[1], [0], [0], [1], [0, 0, 1, 1], [], []>} : vector<8x32xf32>, vector<32x32xf32>, vector<8x32xf32> -> vector<8x32xf32>
    %c0_3 = arith.constant 0 : index
    %c0_4 = arith.constant 0 : index
    %3 = vector.load %arg3[%c0_3, %c0_4] : memref<1x32xf32, #tpu.memory_space<vmem>>, vector<1x32xf32>
    %4 = vector.broadcast %3 : vector<1x32xf32> to vector<8x32xf32>
    %5 = arith.addf %2, %4 : vector<8x32xf32>
    %6 = math.tanh %5 : vector<8x32xf32>
    %c0_5 = arith.constant 0 : index
    %c0_6 = arith.constant 0 : index
    %7 = vector.load %arg4[%c0_5, %c0_6] : memref<32x7xf32, #tpu.memory_space<vmem>>, vector<32x7xf32>
    %cst_7 = arith.constant dense<0.000000e+00> : vector<8x7xf32>
    %8 = tpu.matmul %6, %7, %cst_7 {dimension_numbers = #tpu.dot_dimension_numbers<[1], [0], [0], [1], [0, 0, 1, 1], [], []>} : vector<8x32xf32>, vector<32x7xf32>, vector<8x7xf32> -> vector<8x7xf32>
    %c0_8 = arith.constant 0 : index
    %c0_9 = arith.constant 0 : index
    %9 = vector.load %arg5[%c0_8, %c0_9] : memref<1x7xf32, #tpu.memory_space<vmem>>, vector<1x7xf32>
    %10 = vector.broadcast %9 : vector<1x7xf32> to vector<8x7xf32>
    %11 = arith.addf %8, %10 : vector<8x7xf32>
    %12 = vector.extract_strided_slice %11 {offsets = [0, 6], sizes = [8, 1], strides = [1, 1]} : vector<8x7xf32> to vector<8x1xf32>
    %13 = tpu.iota {dimensions = array<i32: 1>} : vector<8x7xi32>
    %c6_i32 = arith.constant 6 : i32
    %14 = vector.broadcast %c6_i32 : i32 to vector<8x7xi32>
    %15 = arith.cmpi slt, %13, %14 : vector<8x7xi32>
    %cst_10 = arith.constant 0xFF800000 : f32
    %16 = vector.broadcast %cst_10 : f32 to vector<8x7xf32>
    %17 = arith.select %15, %11, %16 : vector<8x7xi1>, vector<8x7xf32>
    %cst_11 = arith.constant dense<0xFF800000> : vector<8xf32>
    %18 = vector.multi_reduction <maximumf>, %17, %cst_11 [1] : vector<8x7xf32> to vector<8xf32>
    %19 = vector.shape_cast %18 : vector<8xf32> to vector<8x1xf32>
    %20 = vector.broadcast %19 : vector<8x1xf32> to vector<8x7xf32>
    %21 = arith.cmpf oeq, %17, %20 : vector<8x7xf32>
    %c2147483647_i32 = arith.constant 2147483647 : i32
    %22 = vector.broadcast %c2147483647_i32 : i32 to vector<8x7xi32>
    %23 = arith.select %21, %13, %22 : vector<8x7xi1>, vector<8x7xi32>
    %cst_12 = arith.constant dense<2147483647> : vector<8xi32>
    %24 = vector.multi_reduction <minsi>, %23, %cst_12 [1] : vector<8x7xi32> to vector<8xi32>
    %25 = vector.shape_cast %24 : vector<8xi32> to vector<8x1xi32>
    %26 = vector.broadcast %19 : vector<8x1xf32> to vector<8x7xf32>
    %27 = arith.subf %17, %26 : vector<8x7xf32>
    %28 = math.exp %27 : vector<8x7xf32>
    %cst_13 = arith.constant dense<0.000000e+00> : vector<8xf32>
    %29 = vector.multi_reduction <add>, %28, %cst_13 [1] : vector<8x7xf32> to vector<8xf32>
    %30 = vector.shape_cast %29 : vector<8xf32> to vector<8x1xf32>
    %31 = math.log %30 : vector<8x1xf32>
    %32 = arith.addf %19, %31 : vector<8x1xf32>
    %33 = arith.subf %19, %32 : vector<8x1xf32>
    %c0_14 = arith.constant 0 : index
    %c0_15 = arith.constant 0 : index
    %34 = vector.load %arg6[%c0_14, %c0_15] : memref<8x1xf32, #tpu.memory_space<vmem>>, vector<8x1xf32>
    tpu.vector_store %arg6[%c0_14, %c0_15], %12 {strides = array<i32>} : memref<8x1xf32, #tpu.memory_space<vmem>>, vector<8x1xf32>,
    %c0_16 = arith.constant 0 : index
    %c0_17 = arith.constant 0 : index
    %35 = vector.load %arg7[%c0_16, %c0_17] : memref<8x1xi32, #tpu.memory_space<vmem>>, vector<8x1xi32>
    tpu.vector_store %arg7[%c0_16, %c0_17], %25 {strides = array<i32>} : memref<8x1xi32, #tpu.memory_space<vmem>>, vector<8x1xi32>,
    %c0_18 = arith.constant 0 : index
    %c0_19 = arith.constant 0 : index
    %36 = vector.load %arg8[%c0_18, %c0_19] : memref<8x1xf32, #tpu.memory_space<vmem>>, vector<8x1xf32>
    tpu.vector_store %arg8[%c0_18, %c0_19], %33 {strides = array<i32>} : memref<8x1xf32, #tpu.memory_space<vmem>>, vector<8x1xf32>,
    return
  }
  func.func @transform_0(%arg0: i32) -> (i32, i32) {
    %c0_i32 = arith.constant 0 : i32
    %c0_i32_0 = arith.constant 0 : i32
    return %arg0, %c0_i32 : i32, i32
  }
  func.func @transform_1(%arg0: i32) -> (i32, i32) {
    %c0_i32 = arith.constant 0 : i32
    %c0_i32_0 = arith.constant 0 : i32
    %c0_i32_1 = arith.constant 0 : i32
    return %c0_i32, %c0_i32_0 : i32, i32
  }
  func.func @transform_2(%arg0: i32) -> (i32, i32) {
    %c0_i32 = arith.constant 0 : i32
    %c0_i32_0 = arith.constant 0 : i32
    %c0_i32_1 = arith.constant 0 : i32
    return %c0_i32, %c0_i32_0 : i32, i32
  }
  func.func @transform_3(%arg0: i32) -> (i32, i32) {
    %c0_i32 = arith.constant 0 : i32
    %c0_i32_0 = arith.constant 0 : i32
    %c0_i32_1 = arith.constant 0 : i32
    return %c0_i32, %c0_i32_0 : i32, i32
  }
  func.func @transform_4(%arg0: i32) -> (i32, i32) {
    %c0_i32 = arith.constant 0 : i32
    %c0_i32_0 = arith.constant 0 : i32
    %c0_i32_1 = arith.constant 0 : i32
    return %c0_i32, %c0_i32_0 : i32, i32
  }
  func.func @transform_5(%arg0: i32) -> (i32, i32) {
    %c0_i32 = arith.constant 0 : i32
    %c0_i32_0 = arith.constant 0 : i32
    return %arg0, %c0_i32 : i32, i32
  }
  func.func @transform_6(%arg0: i32) -> (i32, i32) {
    %c0_i32 = arith.constant 0 : i32
    %c0_i32_0 = arith.constant 0 : i32
    return %arg0, %c0_i32 : i32, i32
  }
  func.func @transform_7(%arg0: i32) -> (i32, i32) {
    %c0_i32 = arith.constant 0 : i32
    %c0_i32_0 = arith.constant 0 : i32
    return %arg0, %c0_i32 : i32, i32
  }
}

</mosaic_0001>

<bundles_post_ra>
// kernel: tpu_custom_call.1
= control target key start
LH: loop header
LB: loop body
LE: loop exit
PB: predicated region body
PF: predicated region fallthrough
CT: control target
= control target key end

     0   :  { %vm32_vm0 = vcmask 261120   ;;  %v88_v13 = vlaneseq  ;;  %vm92_vm2 = vcmask 56320   ;;  %vm127_vm3 = vcmask 7168   ;;  %s245_s1 = inlined_call_operand.vmem [shape: f32[32,32], index: 1, kind: input, shape index: {}]   ;;  %s246_s2 = inlined_call_operand.vmem [shape: f32[1,32], index: 2, kind: input, shape index: {}]   ;;  %s247_s0 = inlined_call_operand.vmem [shape: f32[8,32], index: 0, kind: input, shape index: {}]   ;;  %s248_s4 = inlined_call_operand.vmem [shape: f32[1,7], index: 4, kind: input, shape index: {}]   ;;  %s249_s3 = inlined_call_operand.vmem [shape: f32[32,7], index: 3, kind: input, shape index: {}]   ;;  %s250_s5 = inlined_call_operand.vmem [shape: f32[8,1], index: 5, kind: output, shape index: {0}]   ;;  %s251_s7 = inlined_call_operand.vmem [shape: f32[8,1], index: 7, kind: output, shape index: {2}]   ;;  %s252_s6 = inlined_call_operand.vmem [shape: s32[8,1], index: 6, kind: output, shape index: {1}]  }
   0x1   :  { %v27_v0 = vld [vmem:[%s245_s1 + $0x18] sm:$0xff]  ;;  %v26_v1 = vld [vmem:[%s245_s1 + $0x10] sm:$0xff]  ;;  %v25_v2 = vld [vmem:[%s245_s1 + $0x8] sm:$0xff] }
   0x2   :  { %48 = vmatpush.msra.mxu0 %v27_v0  ;;  %v24_v3 = vld [vmem:[%s245_s1] sm:$0xff]  ;;  %v60_v5 = vld [vmem:[%s249_s3 + $0x18] sm:$0xff]  ;;  %v59_v6 = vld [vmem:[%s249_s3 + $0x10] sm:$0xff]  ;;  %v89_v14 = vand.u32 127, %v88_v13 }
   0x3   :  { %v23_v4 = vld [vmem:[%s247_s0] sm:$0xff]  ;;  %80 = vmatpush.msra.mxu1 %v60_v5  ;;  %v58_v7 = vld [vmem:[%s249_s3 + $0x8] sm:$0xff] }
   0x4   :  { %49 = vmatpush.msra.mxu0 %v26_v1  ;;  %v57_v8 = vld [vmem:[%s249_s3] sm:$0xff]  ;;  %vm90_vm1 = vcmp.lt.s32.totalorder %v89_v14, 6  ;;  %s154_s3 = smov 122  }
   0x5   :  { %81 = vmatpush.msra.mxu1 %v59_v6  ;;  %v146_v9 = vld [vmem:[%s246_s2] ss:$0 sm:$0xff] }
   0x6   :  { %50 = vmatpush.msra.mxu0 %v25_v2  ;;  %v147_v15 = vld [vmem:[%s248_s4] ss:$0 sm:$0xff] }
   0x7   :  { %82 = vmatpush.msra.mxu1 %v58_v7 }
   0x8   :  { %51 = vmatpush.msra.mxu0 %v24_v3 }
   0x9   :  { %143 = vmatmul.msk.f32.vlgmr.msra.gmra.mxu0 %vm32_vm0, %v23_v4  ;;  %83 = vmatpush.msra.mxu1 %v57_v8 }
  0x86   :  { %v53_v10 = vpop.f32.mrf.mxu0 }
  0x87   :  { %v54_v11 = vadd.f32 %v146_v9, %v53_v10 }
  0x89   :  { %148 = vtanh.f32 %v54_v11 }
  0x8f   :  { %v149_v12 = vpop.eup %148 }
  0x90   :  { %144 = vmatmul.msk.f32.vlgmr.msra.gmra.mxu1 %vm32_vm0, %v149_v12 }
 0x10d   :  { %v85_v16 = vpop.f32.mrf.mxu1 }
 0x10e   :  { %v86_v17 = vadd.f32 %v147_v15, %v85_v16 }
 0x110   :  { %124 = vrot.lane.b32.xlu2 %v86_v17, %s154_s3  ;;  %v91_v18 = vsel %vm90_vm1, %v86_v17, -inf }
 0x111   :  { %v93_v19 = vsel %vm92_vm2, %v91_v18, -inf }
 0x112   :  { %94 = vmax.xlane.f32.xlu0 %v93_v19 }
 0x16a   :  { %v125_v20 = vpop.permute.xlu2 %124 }
 0x16b   :  { %128 = vst.msk [vmem:[%s250_s5] sm:$0xff] %vm127_vm3, %v125_v20 }
 0x185   :  { %v95_v21 = vpop.xlane.xlu0 %94 }
 0x186   :  { %v113_v22 = vsub.f32 %v91_v18, %v95_v21  ;;  %vm96_vm4 = vcmp.eq.f32.partialorder %v91_v18, %v95_v21 }
 0x187   :  { %v97_v23 = vsel %vm96_vm4, %v89_v14, 2147483647 }
 0x188   :  { %v114_v24 = vmul.f32 1.442695, %v113_v22  ;;  %v98_v25 = vsel %vm92_vm2, %v97_v23, 2147483647 }
 0x189   :  { %v100_v26 = vshra.s32 %v98_v25, 16  ;;  %v99_v30 = vand.u32 65535, %v98_v25 }
 0x18a   :  { %150 = vpow2.f32 %v114_v24 }
 0x18b   :  { %v102_v27 = vcvt.s32.f32 %v100_v26  ;;  %v101_v32 = vcvt.s32.f32 %v99_v30 }
 0x18d   :  { %103 = vmin.xlane.f32.xlu0 %v102_v27 }
 0x190   :  { %v151_v28 = vpop.eup %150 }
 0x191   :  { %v116_v29 = vsel %vm92_vm2, %v151_v28, 0.0 }
 0x192   :  { %117 = vadd.xlane.f32.xlu1 %v116_v29 }
 0x200   :  { %v104_v31 = vpop.xlane.xlu0 %103 }
 0x201   :  { %vm105_vm5 = vcmp.eq.f32.partialorder %v102_v27, %v104_v31  ;;  %v110_v39 = vcvt.f32.s32 %v104_v31 }
 0x202   :  { %v106_v33 = vsel %vm105_vm5, %v101_v32, inf }
 0x203   :  { %107 = vmin.xlane.f32.xlu1 %v106_v33  ;;  %v111_v41 = vshll.u32 %v110_v39, 16 }
 0x205   :  { %v118_v34 = vpop.xlane.xlu1 %117 }
 0x206   :  { %152 = vlog2.f32 %v118_v34 }
 0x20c   :  { %v153_v35 = vpop.eup %152 }
 0x20d   :  { %v120_v36 = vmul.f32 0.6931472, %v153_v35 }
 0x20f   :  { %v121_v37 = vadd.f32 %v120_v36, %v95_v21 }
 0x211   :  { %v122_v38 = vsub.f32 %v95_v21, %v121_v37 }
 0x213   :  { %130 = vst.msk [vmem:[%s251_s7] sm:$0xff] %vm127_vm3, %v122_v38 }
 0x276   :  { %v108_v40 = vpop.xlane.xlu1 %107 }
 0x277   :  { %v109_v42 = vcvt.f32.s32 %v108_v40 }
 0x279   :  { %v112_v43 = vadd.s32 %v111_v41, %v109_v42 }
 0x27b   :  { %129 = vst.msk [vmem:[%s252_s6] sm:$0xff] %vm127_vm3, %v112_v43 }

</bundles_post_ra>
